<compile_context>
chip_gen: v5e
topology: v5e:2x2
jax: 0.10.0
libtpu: 0.0.40
codegen_flags: <defaults>
</compile_context>

<pallas_src>
import jax
import jax.numpy as jnp
from jax.experimental import pallas as pl
from jax.experimental.pallas import tpu as pltpu

EPS = 1e-6
FT_ALPHA = 0.7
FT_BETA = 0.3
FT_GAMMA = 0.75

LANES = 128
BUDGET_BYTES = 24 * 1024 * 1024     # double-buffered input blocks budget
VMEM_LIMIT = 40 * 1024 * 1024       # <= v7x 64 MiB physical VMEM
TP_MAX = 128 * 1024                 # lane cap per grid step
ROW_TILE_MIN_TP = 1024              # tile R only if it forces TP below this


def _make_kernel(tp_lanes: int, n_j: int, n_full_chunks: int,
                 p_total: int, need_tail: bool):
    """Kernel closure capturing static tiling parameters."""

    def sigmoid(v):
        # EUP-friendly exact sigmoid: one tanh, no exp + divide.
        return 0.5 * jnp.tanh(0.5 * v) + 0.5

    def kernel(logit_ref, mask_ref, tp_out, s_out, t_out):
        s_idx = pl.program_id(1)          # pixel-range split (megacore)
        j = pl.program_id(2)              # pixel chunk within the split

        @pl.when(j == 0)
        def _init():
            tp_out[...] = jnp.zeros_like(tp_out)
            s_out[...] = jnp.zeros_like(s_out)
            t_out[...] = jnp.zeros_like(t_out)

        x = logit_ref[...].astype(jnp.float32)   # (RB, TP)
        t = mask_ref[...].astype(jnp.float32)    # (RB, TP)

        def accumulate(sv, tv):
            # Only sum(s*t), sum(s), sum(t); fn/fp derived in the wrapper.
            tp_out[0, 0] += jnp.sum(sv * tv, axis=1, keepdims=True)
            s_out[0, 0] += jnp.sum(sv, axis=1, keepdims=True)
            t_out[0, 0] += jnp.sum(tv, axis=1, keepdims=True)

        if need_tail:
            chunk = s_idx * n_j + j

            @pl.when(chunk < n_full_chunks)
            def _steady():
                accumulate(sigmoid(x), t)

            @pl.when(chunk >= n_full_chunks)
            def _tail():
                # Ragged (or fully out-of-range) chunk: mask invalid lanes.
                lane = jax.lax.broadcasted_iota(jnp.int32, (1, tp_lanes), 1)
                valid = (chunk * tp_lanes + lane) < p_total
                accumulate(jnp.where(valid, sigmoid(x), 0.0),
                           jnp.where(valid, t, 0.0))
        else:
            accumulate(sigmoid(x), t)

    return kernel


def focal_tversky_loss(outputs: jax.Array, targets: jax.Array) -> jax.Array:
    """outputs, targets: NCHW arrays (any float dtype). Returns scalar f32."""
    N, C, H, W = outputs.shape
    R = N * C
    P = H * W

    # Contiguous (free) reshape: NCHW -> (N*C, H*W). No transpose, no pad.
    o2 = outputs.reshape(R, P)
    t2 = targets.reshape(R, P)

    item_bytes = o2.dtype.itemsize + t2.dtype.itemsize

    # ---- rows per block (guard for huge N*C) ---------------------------
    RB = R
    if 2 * R * item_bytes * ROW_TILE_MIN_TP > BUDGET_BYTES:
        RB = max(8, ((BUDGET_BYTES // (2 * item_bytes * ROW_TILE_MIN_TP)) // 8) * 8)
    n_r_blocks = pl.cdiv(R, RB)

    # ---- pixel lanes per block -----------------------------------------
    tp_cap = (BUDGET_BYTES // (2 * RB * item_bytes) // LANES) * LANES
    tp_cap = max(tp_cap, LANES)
    TP = min(tp_cap, TP_MAX, pl.cdiv(P, LANES) * LANES)

    n_chunks = pl.cdiv(P, TP)
    n_splits = min(2, n_chunks)              # v7x megacore split of pixel range
    n_j = pl.cdiv(n_chunks, n_splits)
    n_full = P // TP                          # chunks fully inside P
    need_tail = (n_splits * n_j) != n_full    # any ragged / overhanging chunk?

    def in_map(r, s, j):
        chunk = jnp.minimum(s * n_j + j, n_chunks - 1)   # keep DMA in-bounds
        return (r, chunk)

    def out_map(r, s, j):
        return (r, s, 0, 0)

    part_shape = jax.ShapeDtypeStruct((n_r_blocks, n_splits, RB, 1), jnp.float32)
    kernel = _make_kernel(TP, n_j, n_full, P, need_tail)

    tp_p, s_p, t_p = pl.pallas_call(
        kernel,
        out_shape=(part_shape, part_shape, part_shape),
        grid_spec=pltpu.PrefetchScalarGridSpec(
            num_scalar_prefetch=0,
            grid=(n_r_blocks, n_splits, n_j),
            in_specs=[
                pl.BlockSpec((RB, TP), in_map),
                pl.BlockSpec((RB, TP), in_map),
            ],
            out_specs=(
                pl.BlockSpec((1, 1, RB, 1), out_map),
                pl.BlockSpec((1, 1, RB, 1), out_map),
                pl.BlockSpec((1, 1, RB, 1), out_map),
            ),
        ),
        compiler_params=pltpu.CompilerParams(
            dimension_semantics=("parallel", "parallel", "arbitrary"),
            vmem_limit_bytes=VMEM_LIMIT,
        ),
    )(o2, t2)

    def combine(a):
        a = jnp.sum(a, axis=1)[..., 0]        # (n_r_blocks, RB): sum over splits
        a = a.reshape(-1)[:R]                 # (R,): drop padded rows
        return a.reshape(N, C).sum(axis=0)    # (C,): reduce over batch

    tp = combine(tp_p)
    s_sum = combine(s_p)
    t_sum = combine(t_p)

    # fn/fp derived algebraically; clamp against f32 cancellation so the
    # fractional power never sees a negative base.
    fn = jnp.maximum(t_sum - tp, 0.0)         # sum((1-s)*t)
    fp = jnp.maximum(s_sum - tp, 0.0)         # sum(s*(1-t))
    ti = (tp + EPS) / (tp + FT_ALPHA * fn + FT_BETA * fp + EPS)
    tfl = jnp.maximum(1.0 - ti, 0.0) ** FT_GAMMA
    return jnp.mean(tfl)


def _reference(outputs, targets):
    """Pure-JAX reference mirroring the PyTorch forward."""
    s = jax.nn.sigmoid(outputs.astype(jnp.float32))
    t = targets.astype(jnp.float32)
    tp = jnp.sum(s * t, axis=(0, 2, 3))
    fn = jnp.sum((1.0 - s) * t, axis=(0, 2, 3))
    fp = jnp.sum(s * (1.0 - t), axis=(0, 2, 3))
    ti = (tp + EPS) / (tp + FT_ALPHA * fn + FT_BETA * fp + EPS)
    tfl = (1.0 - ti) ** FT_GAMMA
    return jnp.mean(tfl)


if __name__ == "__main__":
    key = jax.random.PRNGKey(0)
    k_out, k_tgt = jax.random.split(key)

    N, C, H, W = 2, 4, 16, 16
    outputs = jax.random.normal(k_out, (N, C, H, W), dtype=jnp.float32)
    targets = (jax.random.uniform(k_tgt, (N, C, H, W)) > 0.5).astype(jnp.float32)

    loss = jax.jit(focal_tversky_loss)(outputs, targets)
    jax.block_until_ready(loss)

    ref = _reference(outputs, targets)
    assert jnp.allclose(loss, ref, atol=1e-5, rtol=1e-5), (loss, ref)

    print("KERNEL_OK")
</pallas_src>

<mosaic_0001>
module attributes {stable_mosaic.version = 11 : i64} {
  func.func @kernel(%arg0: i32, %arg1: i32, %arg2: i32, %arg3: memref<8x256xf32, #tpu.memory_space<vmem>>, %arg4: memref<8x256xf32, #tpu.memory_space<vmem>>, %arg5: memref<1x1x8x1xf32, #tpu.memory_space<vmem>>, %arg6: memref<1x1x8x1xf32, #tpu.memory_space<vmem>>, %arg7: memref<1x1x8x1xf32, #tpu.memory_space<vmem>>) attributes {dimension_semantics = [#tpu.dimension_semantics<parallel>, #tpu.dimension_semantics<parallel>, #tpu.dimension_semantics<arbitrary>], iteration_bounds = array<i64: 1, 1, 1>, scalar_prefetch = 0 : i64, scratch_operands = 0 : i64, tpu.core_type = #tpu.core_type<tc>, window_params = [{transform_indices = @transform_0, window_bounds = array<i64: 8, 256>}, {transform_indices = @transform_1, window_bounds = array<i64: 8, 256>}, {transform_indices = @transform_2, window_bounds = array<i64: 1, 1, 8, 1>}, {transform_indices = @transform_3, window_bounds = array<i64: 1, 1, 8, 1>}, {transform_indices = @transform_4, window_bounds = array<i64: 1, 1, 8, 1>}]} {
    %c0_i32 = arith.constant 0 : i32
    %0 = arith.cmpi eq, %arg2, %c0_i32 : i32
    %1 = arith.extui %0 : i1 to i32
    %c0_i32_0 = arith.constant 0 : i32
    %2 = arith.cmpi ne, %1, %c0_i32_0 : i32
    scf.if %2 {
      %cst_33 = arith.constant 0.000000e+00 : f32
      %37 = vector.broadcast %cst_33 : f32 to vector<1x1x8x1xf32>
      %c0_34 = arith.constant 0 : index
      %c0_35 = arith.constant 0 : index
      %c0_36 = arith.constant 0 : index
      %c0_37 = arith.constant 0 : index
      %38 = vector.load %arg5[%c0_34, %c0_35, %c0_36, %c0_37] : memref<1x1x8x1xf32, #tpu.memory_space<vmem>>, vector<1x1x8x1xf32>
      tpu.vector_store %arg5[%c0_34, %c0_35, %c0_36, %c0_37], %37 {strides = array<i32>} : memref<1x1x8x1xf32, #tpu.memory_space<vmem>>, vector<1x1x8x1xf32>,
      %cst_38 = arith.constant 0.000000e+00 : f32
      %39 = vector.broadcast %cst_38 : f32 to vector<1x1x8x1xf32>
      %c0_39 = arith.constant 0 : index
      %c0_40 = arith.constant 0 : index
      %c0_41 = arith.constant 0 : index
      %c0_42 = arith.constant 0 : index
      %40 = vector.load %arg6[%c0_39, %c0_40, %c0_41, %c0_42] : memref<1x1x8x1xf32, #tpu.memory_space<vmem>>, vector<1x1x8x1xf32>
      tpu.vector_store %arg6[%c0_39, %c0_40, %c0_41, %c0_42], %39 {strides = array<i32>} : memref<1x1x8x1xf32, #tpu.memory_space<vmem>>, vector<1x1x8x1xf32>,
      %cst_43 = arith.constant 0.000000e+00 : f32
      %41 = vector.broadcast %cst_43 : f32 to vector<1x1x8x1xf32>
      %c0_44 = arith.constant 0 : index
      %c0_45 = arith.constant 0 : index
      %c0_46 = arith.constant 0 : index
      %c0_47 = arith.constant 0 : index
      %42 = vector.load %arg7[%c0_44, %c0_45, %c0_46, %c0_47] : memref<1x1x8x1xf32, #tpu.memory_space<vmem>>, vector<1x1x8x1xf32>
      tpu.vector_store %arg7[%c0_44, %c0_45, %c0_46, %c0_47], %41 {strides = array<i32>} : memref<1x1x8x1xf32, #tpu.memory_space<vmem>>, vector<1x1x8x1xf32>,
    } else {
    }
    %c0 = arith.constant 0 : index
    %c0_1 = arith.constant 0 : index
    %3 = vector.load %arg3[%c0, %c0_1] : memref<8x256xf32, #tpu.memory_space<vmem>>, vector<8x256xf32>
    %c0_2 = arith.constant 0 : index
    %c0_3 = arith.constant 0 : index
    %4 = vector.load %arg4[%c0_2, %c0_3] : memref<8x256xf32, #tpu.memory_space<vmem>>, vector<8x256xf32>
    %cst = arith.constant 5.000000e-01 : f32
    %5 = vector.broadcast %cst : f32 to vector<8x256xf32>
    %6 = arith.mulf %5, %3 : vector<8x256xf32>
    %7 = math.tanh %6 : vector<8x256xf32>
    %cst_4 = arith.constant 5.000000e-01 : f32
    %8 = vector.broadcast %cst_4 : f32 to vector<8x256xf32>
    %9 = arith.mulf %8, %7 : vector<8x256xf32>
    %cst_5 = arith.constant 5.000000e-01 : f32
    %10 = vector.broadcast %cst_5 : f32 to vector<8x256xf32>
    %11 = arith.addf %9, %10 : vector<8x256xf32>
    %c0_6 = arith.constant 0 : index
    %c0_7 = arith.constant 0 : index
    %c0_8 = arith.constant 0 : index
    %c0_9 = arith.constant 0 : index
    %12 = vector.load %arg5[%c0_6, %c0_7, %c0_8, %c0_9] : memref<1x1x8x1xf32, #tpu.memory_space<vmem>>, vector<1x1x8x1xf32>
    %13 = vector.shape_cast %12 : vector<1x1x8x1xf32> to vector<8x1xf32>
    %14 = arith.mulf %11, %4 : vector<8x256xf32>
    %cst_10 = arith.constant dense<0.000000e+00> : vector<8xf32>
    %15 = vector.multi_reduction <add>, %14, %cst_10 [1] : vector<8x256xf32> to vector<8xf32>
    %16 = vector.shape_cast %15 : vector<8xf32> to vector<8x1xf32>
    %17 = arith.addf %13, %16 : vector<8x1xf32>
    %c0_11 = arith.constant 0 : index
    %c0_12 = arith.constant 0 : index
    %c0_13 = arith.constant 0 : index
    %c0_14 = arith.constant 0 : index
    %18 = vector.load %arg5[%c0_11, %c0_12, %c0_13, %c0_14] : memref<1x1x8x1xf32, #tpu.memory_space<vmem>>, vector<1x1x8x1xf32>
    %19 = vector.shape_cast %18 : vector<1x1x8x1xf32> to vector<8x1xf32>
    %20 = vector.shape_cast %17 : vector<8x1xf32> to vector<1x1x8x1xf32>
    tpu.vector_store %arg5[%c0_11, %c0_12, %c0_13, %c0_14], %20 {strides = array<i32>} : memref<1x1x8x1xf32, #tpu.memory_space<vmem>>, vector<1x1x8x1xf32>,
    %c0_15 = arith.constant 0 : index
    %c0_16 = arith.constant 0 : index
    %c0_17 = arith.constant 0 : index
    %c0_18 = arith.constant 0 : index
    %21 = vector.load %arg6[%c0_15, %c0_16, %c0_17, %c0_18] : memref<1x1x8x1xf32, #tpu.memory_space<vmem>>, vector<1x1x8x1xf32>
    %22 = vector.shape_cast %21 : vector<1x1x8x1xf32> to vector<8x1xf32>
    %cst_19 = arith.constant dense<0.000000e+00> : vector<8xf32>
    %23 = vector.multi_reduction <add>, %11, %cst_19 [1] : vector<8x256xf32> to vector<8xf32>
    %24 = vector.shape_cast %23 : vector<8xf32> to vector<8x1xf32>
    %25 = arith.addf %22, %24 : vector<8x1xf32>
    %c0_20 = arith.constant 0 : index
    %c0_21 = arith.constant 0 : index
    %c0_22 = arith.constant 0 : index
    %c0_23 = arith.constant 0 : index
    %26 = vector.load %arg6[%c0_20, %c0_21, %c0_22, %c0_23] : memref<1x1x8x1xf32, #tpu.memory_space<vmem>>, vector<1x1x8x1xf32>
    %27 = vector.shape_cast %26 : vector<1x1x8x1xf32> to vector<8x1xf32>
    %28 = vector.shape_cast %25 : vector<8x1xf32> to vector<1x1x8x1xf32>
    tpu.vector_store %arg6[%c0_20, %c0_21, %c0_22, %c0_23], %28 {strides = array<i32>} : memref<1x1x8x1xf32, #tpu.memory_space<vmem>>, vector<1x1x8x1xf32>,
    %c0_24 = arith.constant 0 : index
    %c0_25 = arith.constant 0 : index
    %c0_26 = arith.constant 0 : index
    %c0_27 = arith.constant 0 : index
    %29 = vector.load %arg7[%c0_24, %c0_25, %c0_26, %c0_27] : memref<1x1x8x1xf32, #tpu.memory_space<vmem>>, vector<1x1x8x1xf32>
    %30 = vector.shape_cast %29 : vector<1x1x8x1xf32> to vector<8x1xf32>
    %cst_28 = arith.constant dense<0.000000e+00> : vector<8xf32>
    %31 = vector.multi_reduction <add>, %4, %cst_28 [1] : vector<8x256xf32> to vector<8xf32>
    %32 = vector.shape_cast %31 : vector<8xf32> to vector<8x1xf32>
    %33 = arith.addf %30, %32 : vector<8x1xf32>
    %c0_29 = arith.constant 0 : index
    %c0_30 = arith.constant 0 : index
    %c0_31 = arith.constant 0 : index
    %c0_32 = arith.constant 0 : index
    %34 = vector.load %arg7[%c0_29, %c0_30, %c0_31, %c0_32] : memref<1x1x8x1xf32, #tpu.memory_space<vmem>>, vector<1x1x8x1xf32>
    %35 = vector.shape_cast %34 : vector<1x1x8x1xf32> to vector<8x1xf32>
    %36 = vector.shape_cast %33 : vector<8x1xf32> to vector<1x1x8x1xf32>
    tpu.vector_store %arg7[%c0_29, %c0_30, %c0_31, %c0_32], %36 {strides = array<i32>} : memref<1x1x8x1xf32, #tpu.memory_space<vmem>>, vector<1x1x8x1xf32>,
    return
  }
  func.func @transform_0(%arg0: i32, %arg1: i32, %arg2: i32) -> (i32, i32) {
    %c1_i32 = arith.constant 1 : i32
    %0 = arith.muli %arg1, %c1_i32 : i32
    %1 = arith.addi %0, %arg2 : i32
    %c0_i32 = arith.constant 0 : i32
    %2 = arith.minsi %1, %c0_i32 : i32
    %c0_i32_0 = arith.constant 0 : i32
    return %arg0, %2 : i32, i32
  }
  func.func @transform_1(%arg0: i32, %arg1: i32, %arg2: i32) -> (i32, i32) {
    %c1_i32 = arith.constant 1 : i32
    %0 = arith.muli %arg1, %c1_i32 : i32
    %1 = arith.addi %0, %arg2 : i32
    %c0_i32 = arith.constant 0 : i32
    %2 = arith.minsi %1, %c0_i32 : i32
    %c0_i32_0 = arith.constant 0 : i32
    return %arg0, %2 : i32, i32
  }
  func.func @transform_2(%arg0: i32, %arg1: i32, %arg2: i32) -> (i32, i32, i32, i32) {
    %c0_i32 = arith.constant 0 : i32
    %c0_i32_0 = arith.constant 0 : i32
    %c0_i32_1 = arith.constant 0 : i32
    return %arg0, %arg1, %c0_i32, %c0_i32_0 : i32, i32, i32, i32
  }
  func.func @transform_3(%arg0: i32, %arg1: i32, %arg2: i32) -> (i32, i32, i32, i32) {
    %c0_i32 = arith.constant 0 : i32
    %c0_i32_0 = arith.constant 0 : i32
    %c0_i32_1 = arith.constant 0 : i32
    return %arg0, %arg1, %c0_i32, %c0_i32_0 : i32, i32, i32, i32
  }
  func.func @transform_4(%arg0: i32, %arg1: i32, %arg2: i32) -> (i32, i32, i32, i32) {
    %c0_i32 = arith.constant 0 : i32
    %c0_i32_0 = arith.constant 0 : i32
    %c0_i32_1 = arith.constant 0 : i32
    return %arg0, %arg1, %c0_i32, %c0_i32_0 : i32, i32, i32, i32
  }
}

</mosaic_0001>

<bundles_post_ra>
// kernel: squeeze.3
= control target key start
LH: loop header
LB: loop body
LE: loop exit
PB: predicated region body
PF: predicated region fallthrough
CT: control target
= control target key end

     0   :  { %vm7_vm0 = vcmask 31744   ;;  %s39_s0 = inlined_call_operand.vmem [shape: f32[8], index: 0, kind: input, shape index: {}]   ;;  %s40_s1 = inlined_call_operand.vmem [shape: f32[2,4], index: 1, kind: output, shape index: {}]  }
   0x1   :  { %v4_v0 = vld [vmem:[%s39_s0] sm:$0x1]  ;;  %s22_s0 = smov 124  }
   0x2   :  { %5 = vst [vmem:[#allocation1] sm:$0x1] %v4_v0 }
   0x9   :  { %v9_v1 = vld [vmem:[#allocation1] sm:$0x1]  }
   0xa   :  { %v6_v2 = vld [vmem:[#allocation1] sm:$0x1]   ;;  %10 = vrot.lane.b32.xlu0 %v9_v1, %s22_s0 }
   0xb   :  { %8 = vst.msk [vmem:[#allocation0] sm:$0x1] %vm7_vm0, %v6_v2  }
  0x7c   :  { %v11_v3 = vpop.permute.xlu0 %10  }
  0x7d   :  { %14 = vst.msk [vmem:[#allocation0 + $0x1] sm:$0x1] %vm7_vm0, %v11_v3  }
  0x84   :  { %v17_v4 = vld [vmem:[#allocation0] sm:$0x3] }
  0x85   :  { %20 = vst [vmem:[%s40_s1] sm:$0x3] %v17_v4 }

// kernel: focal_tversky_loss.1
= control target key start
LH: loop header
LB: loop body
LE: loop exit
PB: predicated region body
PF: predicated region fallthrough
CT: control target
= control target key end

     0   :  { %vm82_vm0 = vcmask 7168   ;;  %v148_v2 = vmov 0.0   ;;  %s219_s0 = inlined_call_operand.vmem [shape: f32[8,256], index: 0, kind: input, shape index: {}]   ;;  %s220_s1 = inlined_call_operand.vmem [shape: f32[8,256], index: 1, kind: input, shape index: {}]   ;;  %s221_s2 = inlined_call_operand.vmem [shape: f32[1,1,8,1], index: 2, kind: output, shape index: {0}]   ;;  %s222_s4 = inlined_call_operand.vmem [shape: f32[1,1,8,1], index: 4, kind: output, shape index: {2}]   ;;  %s223_s3 = inlined_call_operand.vmem [shape: f32[1,1,8,1], index: 3, kind: output, shape index: {1}]  }
   0x1   :  { %v86_v0 = vld [vmem:[%s219_s0] sm:$0xff]  ;;  %v87_v1 = vld [vmem:[%s219_s0 + $0x8] sm:$0xff]  ;;  %83 = vst.msk [vmem:[%s221_s2] sm:$0xff] %vm82_vm0, %v148_v2 }
   0x2   :  { %v88_v3 = vld [vmem:[%s220_s1] sm:$0xff]  ;;  %v89_v4 = vld [vmem:[%s220_s1 + $0x8] sm:$0xff]  ;;  %v90_v5 = vmul.f32 0.5, %v86_v0  ;;  %v91_v6 = vmul.f32 0.5, %v87_v1  ;;  %85 = vst.msk [vmem:[%s222_s4] sm:$0xff] %vm82_vm0, %v148_v2 }
   0x3   :  { %v114_v7 = vadd.f32 %v89_v4, %v88_v3  ;;  %84 = vst.msk [vmem:[%s223_s3] sm:$0xff] %vm82_vm0, %v148_v2 }
   0x4   :  { %144 = vtanh.f32 %v90_v5 }
   0x5   :  { %146 = vtanh.f32 %v91_v6  ;;  %115 = vadd.xlane.f32.xlu1 %v114_v7 }
   0x8   :  { %v98_v21 = vld [vmem:[%s221_s2] sm:$0xff] }
   0x9   :  { %v113_v18 = vld [vmem:[%s222_s4] sm:$0xff] }
   0xa   :  { %v145_v8 = vpop.eup %144  ;;  %v107_v24 = vld [vmem:[%s223_s3] sm:$0xff] }
   0xb   :  { %v147_v9 = vpop.eup %146  ;;  %v94_v10 = vmul.f32 0.5, %v145_v8 }
   0xc   :  { %v95_v11 = vmul.f32 0.5, %v147_v9 }
   0xd   :  { %v96_v12 = vadd.f32 0.5, %v94_v10 }
   0xe   :  { %v97_v13 = vadd.f32 0.5, %v95_v11 }
   0xf   :  { %v99_v14 = vmul.f32 %v96_v12, %v88_v3 }
  0x10   :  { %v100_v15 = vmul.f32 %v97_v13, %v89_v4  ;;  %v108_v17 = vadd.f32 %v97_v13, %v96_v12 }
  0x12   :  { %v101_v16 = vadd.f32 %v100_v15, %v99_v14 }
  0x14   :  { %102 = vadd.xlane.f32.xlu0 %v101_v16 }
  0x1c   :  { %109 = vadd.xlane.f32.xlu0 %v108_v17 }
  0x78   :  { %v116_v19 = vpop.xlane.xlu1 %115 }
  0x79   :  { %v117_v20 = vadd.f32 %v116_v19, %v113_v18 }
  0x7b   :  { %118 = vst.msk [vmem:[%s222_s4] sm:$0xff] %vm82_vm0, %v117_v20 }
  0x87   :  { %v103_v22 = vpop.xlane.xlu0 %102 }
  0x88   :  { %v104_v23 = vadd.f32 %v103_v22, %v98_v21 }
  0x8a   :  { %106 = vst.msk [vmem:[%s221_s2] sm:$0xff] %vm82_vm0, %v104_v23 }
  0x8f   :  { %v110_v25 = vpop.xlane.xlu0 %109 }
  0x90   :  { %v111_v26 = vadd.f32 %v110_v25, %v107_v24 }
  0x92   :  { %112 = vst.msk [vmem:[%s223_s3] sm:$0xff] %vm82_vm0, %v111_v26 }

</bundles_post_ra>
